<compile_context>
chip_gen: v6e
topology: v6e:2x2x1
jax: 0.10.0
libtpu: 0.0.40
codegen_flags: <defaults>
</compile_context>

<pallas_src>
import functools
import math

import numpy as np
import jax
import jax.numpy as jnp
from jax.experimental import pallas as pl
from jax.experimental.pallas import tpu as pltpu


# --------------------------------------------------------------- TPU queries

def _query_vmem_capacity_bytes() -> int:
    """Best-effort per-core VMEM capacity; conservative (v7x, 64 MiB) fallback."""
    try:
        info = pltpu.get_tpu_info()
        cap = getattr(info, "vmem_capacity_bytes", None)
        if cap:
            return int(cap)
    except Exception:
        pass
    return 64 << 20


_VMEM_CAPACITY = _query_vmem_capacity_bytes()
_BIG_VMEM = _VMEM_CAPACITY >= (100 << 20)           # v5e / v6e: 128 MiB VMEM
_VMEM_CAP = (112 << 20) if _BIG_VMEM else (56 << 20)

_LANE_WIDTH = 1024                                   # multiple of 128 -> unmasked vst
_TILE_ROWS = 4096 if _BIG_VMEM else 2048             # 16 MiB / 8 MiB f32 blocks
_RBF_BLOCK_BYTES = (8 << 20) if _BIG_VMEM else (4 << 20)


def _vmem_limit(block_bytes: int) -> int:
    # in + out blocks, double-buffered, plus headroom; generation-aware cap.
    need = 4 * block_bytes + (8 << 20)
    return int(min(max(need, 32 << 20), _VMEM_CAP))


def _rbf_params(n_basis: int, span: float):
    centers = np.linspace(-span, span, n_basis)
    gamma = 1.0 / (6.0 * (centers[-1] - centers[-2]) ** 2)
    return tuple(float(c) for c in centers), float(gamma)


# -------------------------------------------- simple elementwise activations

_SQRT_2_OVER_PI = float(np.sqrt(2.0 / np.pi))
_GELU_COEF = 0.044715
_INV_SQRT2 = float(1.0 / np.sqrt(2.0))


def _elementwise_kernel(x_ref, o_ref, *, name, negative_slope, gelu_approximate):
    x = x_ref[...]
    if name == "relu":
        y = jnp.maximum(x, 0.0)
    elif name == "gelu":
        if gelu_approximate:
            # tanh approximation: tanh goes to the EUP slot and co-issues with
            # loads/stores, keeping this branch memory-bound on v7x.
            # TODO(synk): torch F.gelu default is the exact erf form; the tanh
            # approximation deviates by ~1e-3 abs.  Pass gelu_approximate=False
            # for the erf form (VALU polynomial, slower on v7x).
            inner = _SQRT_2_OVER_PI * (x + _GELU_COEF * x * x * x)
            y = 0.5 * x * (1.0 + jnp.tanh(inner))
        else:
            y = 0.5 * x * (1.0 + jax.lax.erf(x * _INV_SQRT2))
    elif name == "leaky relu":
        y = jnp.where(x >= 0, x, negative_slope * x)
    elif name == "tanh":
        y = jnp.tanh(x)
    elif name == "sigmoid":
        y = jax.nn.sigmoid(x)
    else:
        raise ValueError(f"unknown activation: {name}")
    o_ref[...] = y


def _elementwise_activation(x, name, *, negative_slope=0.01, gelu_approximate=True,
                            lane_width=_LANE_WIDTH, tile_rows=_TILE_ROWS):
    orig_shape = x.shape
    total = int(np.prod(orig_shape))
    rows = pl.cdiv(total, lane_width)
    pad = rows * lane_width - total

    flat = x.reshape(-1)
    if pad:  # only materialize a pad copy when the tail is actually ragged
        flat = jnp.pad(flat, (0, pad))
    x2 = flat.reshape(rows, lane_width)

    block_rows = rows if rows <= tile_rows else tile_rows   # tile_rows % 8 == 0
    grid = (pl.cdiv(rows, block_rows),)
    block_bytes = block_rows * lane_width * x2.dtype.itemsize

    out = pl.pallas_call(
        functools.partial(_elementwise_kernel, name=name,
                          negative_slope=negative_slope,
                          gelu_approximate=gelu_approximate),
        out_shape=jax.ShapeDtypeStruct((rows, lane_width), x.dtype),
        grid_spec=pltpu.PrefetchScalarGridSpec(
            num_scalar_prefetch=0,
            grid=grid,
            in_specs=[pl.BlockSpec((block_rows, lane_width), lambda i: (i, 0))],
            out_specs=pl.BlockSpec((block_rows, lane_width), lambda i: (i, 0)),
        ),
        compiler_params=pltpu.CompilerParams(
            dimension_semantics=("parallel",),
            vmem_limit_bytes=_vmem_limit(block_bytes),
        ),
    )(x2)

    if pad:
        return out.reshape(-1)[:total].reshape(orig_shape)
    return out.reshape(orig_shape)


# -------------------------------------------------------- KernelActivation

def _kernel_activation_kernel(x_ref, w_ref, o_ref, *, bcoefs, neg_gamma):
    # x_ref/o_ref: (rows, packed_C); w_ref: (n_basis, packed_C), pre-scaled by
    # exp(-gamma * c_j^2).  Identity used:
    #   exp(-g*(x-c_j)^2) * W_j = exp(-g*x^2 + 2*g*c_j*x) * (W_j * exp(-g*c_j^2))
    x = x_ref[...]
    w = w_ref[...]
    q = neg_gamma * x * x                  # shared -g*x^2, computed once per tile
    acc0 = jnp.zeros_like(x)
    acc1 = jnp.zeros_like(x)
    for j, b in enumerate(bcoefs):         # n_basis is small (10): fully unrolled
        wj = w[j:j + 1, :]                 # 2-D slice, broadcasts over rows
        r = jnp.exp(q + b * x) * wj
        if j % 2 == 0:                     # two accumulators: break the add chain
            acc0 = acc0 + r
        else:
            acc1 = acc1 + r
    o_ref[...] = acc0 + acc1


def kernel_activation(x, weight, *, n_basis=10, span=4.0):
    """KernelActivation forward.

    x: (B, C) f32 ; weight: (C, n_basis) f32 (grouped 1x1 conv weight, squeezed).
    """
    B, C = x.shape
    assert weight.shape == (C, n_basis)
    centers, gamma = _rbf_params(n_basis, span)

    # Pre-scale weights by exp(-gamma*c_j^2) so the per-basis in-kernel math is
    # just exp(q + b_j*x) * W'_j  (2 VALU + 1 EUP + 2 VALU per basis).
    centers_np = np.asarray(centers, dtype=np.float32)
    scale = np.exp(-gamma * centers_np ** 2).astype(np.float32)        # (n_basis,)
    w_t = jnp.transpose(weight * jnp.asarray(scale)[None, :])          # (n_basis, C)
    bcoefs = tuple(float(2.0 * gamma * c) for c in centers)

    # Lane-pack channels up to a multiple of 128: (B, C) -> (rows, k*C).
    if C % 128 == 0:
        k = 1
    else:
        k = 128 // math.gcd(C, 128)
    packed_c = k * C
    pad_b = (-B) % k
    xp = jnp.pad(x, ((0, pad_b), (0, 0))) if pad_b else x
    rows = (B + pad_b) // k
    x2 = xp.reshape(rows, packed_c)
    w_p = jnp.tile(w_t, (1, k)) if k > 1 else w_t                      # (n_basis, packed_c)

    # Row blocks sized to move MBs per grid step (amortize ~0.35 us/step overhead).
    bytes_per_row = packed_c * x2.dtype.itemsize
    target_rows = max(8, (_RBF_BLOCK_BYTES // bytes_per_row) // 8 * 8)
    block_rows = rows if rows <= target_rows else target_rows
    grid = (pl.cdiv(rows, block_rows),)
    block_bytes = (block_rows + n_basis) * packed_c * x2.dtype.itemsize

    out = pl.pallas_call(
        functools.partial(_kernel_activation_kernel, bcoefs=bcoefs,
                          neg_gamma=float(-gamma)),
        out_shape=jax.ShapeDtypeStruct((rows, packed_c), x.dtype),
        grid_spec=pltpu.PrefetchScalarGridSpec(
            num_scalar_prefetch=0,
            grid=grid,
            in_specs=[
                pl.BlockSpec((block_rows, packed_c), lambda i: (i, 0)),
                pl.BlockSpec((n_basis, packed_c), lambda i: (0, 0)),
            ],
            out_specs=pl.BlockSpec((block_rows, packed_c), lambda i: (i, 0)),
        ),
        compiler_params=pltpu.CompilerParams(
            dimension_semantics=("parallel",),
            vmem_limit_bytes=_vmem_limit(block_bytes),
        ),
    )(x2, w_p)

    out = out.reshape(rows * k, C)
    if pad_b:
        out = out[:B]
    return out


# ---------------------------------------------------------- Activation wrapper

def activation_forward(x, activation_func, *, kernel_weight=None,
                       n_basis=10, span=4.0, gelu_approximate=True):
    """Pallas equivalent of mxtaltools Activation.forward."""
    if activation_func is None:
        return x                              # nn.Identity
    name = activation_func.lower()
    if name == "kernel":
        if kernel_weight is None:
            raise ValueError("'kernel' activation needs kernel_weight (filters, n_basis)")
        return kernel_activation(x, kernel_weight, n_basis=n_basis, span=span)
    return _elementwise_activation(x, name, gelu_approximate=gelu_approximate)


# -------------------------------------------------------------------- demo

if __name__ == "__main__":
    key = jax.random.PRNGKey(0)
    k1, k2, k3 = jax.random.split(key, 3)

    # ---- simple elementwise activations on a small 4-D tensor ----
    x = jax.random.normal(k1, (2, 4, 16, 16), dtype=jnp.float32)
    refs = {
        "relu": jnp.maximum(x, 0.0),
        "leaky relu": jnp.where(x >= 0, x, 0.01 * x),
        "tanh": jnp.tanh(x),
        "sigmoid": jax.nn.sigmoid(x),
        "gelu": jax.nn.gelu(x, approximate=True),
    }
    for name, ref in refs.items():
        out = jax.block_until_ready(activation_forward(x, name))
        assert out.shape == x.shape
        assert jnp.allclose(out, ref, atol=1e-5, rtol=1e-5), f"mismatch: {name}"

    # ---- 'kernel' activation (KernelActivation: n_basis=10, span=4, filters=32) ----
    B, C, NB, SPAN = 16, 32, 10, 4.0
    xk = jax.random.normal(k2, (B, C), dtype=jnp.float32)
    w = jax.random.normal(k3, (C, NB), dtype=jnp.float32) / jnp.sqrt(NB)

    out_k = jax.block_until_ready(
        activation_forward(xk, "kernel", kernel_weight=w, n_basis=NB, span=SPAN))

    centers, gamma = _rbf_params(NB, SPAN)
    centers_a = jnp.asarray(centers, dtype=jnp.float32)
    rbf = jnp.exp(jnp.float32(-gamma) * (xk[:, :, None] - centers_a[None, None, :]) ** 2)
    ref_k = jnp.einsum("bcj,cj->bc", rbf, w)
    assert out_k.shape == (B, C)
    assert jnp.allclose(out_k, ref_k, atol=1e-4, rtol=1e-4), "mismatch: kernel activation"

    # ---- identity (activation_func=None) ----
    out_id = activation_forward(xk, None)
    assert jnp.allclose(out_id, xk)

    print("KERNEL_OK")
</pallas_src>

<mosaic_0001>
module attributes {stable_mosaic.version = 11 : i64} {
  func.func @_elementwise_kernel(%arg0: i32, %arg1: memref<2x1024xf32, #tpu.memory_space<vmem>>, %arg2: memref<2x1024xf32, #tpu.memory_space<vmem>>) attributes {dimension_semantics = [#tpu.dimension_semantics<parallel>], iteration_bounds = array<i64: 1>, scalar_prefetch = 0 : i64, scratch_operands = 0 : i64, tpu.core_type = #tpu.core_type<tc>, window_params = [{transform_indices = @transform_0, window_bounds = array<i64: 2, 1024>}, {transform_indices = @transform_1, window_bounds = array<i64: 2, 1024>}]} {
    %c0 = arith.constant 0 : index
    %c0_0 = arith.constant 0 : index
    %0 = vector.load %arg1[%c0, %c0_0] : memref<2x1024xf32, #tpu.memory_space<vmem>>, vector<2x1024xf32>
    %cst = arith.constant 0.000000e+00 : f32
    %1 = vector.broadcast %cst : f32 to vector<2x1024xf32>
    %2 = arith.maximumf %0, %1 : vector<2x1024xf32>
    %c0_1 = arith.constant 0 : index
    %c0_2 = arith.constant 0 : index
    %3 = vector.load %arg2[%c0_1, %c0_2] : memref<2x1024xf32, #tpu.memory_space<vmem>>, vector<2x1024xf32>
    tpu.vector_store %arg2[%c0_1, %c0_2], %2 {strides = array<i32>} : memref<2x1024xf32, #tpu.memory_space<vmem>>, vector<2x1024xf32>,
    return
  }
  func.func @transform_0(%arg0: i32) -> (i32, i32) {
    %c0_i32 = arith.constant 0 : i32
    %c0_i32_0 = arith.constant 0 : i32
    return %arg0, %c0_i32 : i32, i32
  }
  func.func @transform_1(%arg0: i32) -> (i32, i32) {
    %c0_i32 = arith.constant 0 : i32
    %c0_i32_0 = arith.constant 0 : i32
    return %arg0, %c0_i32 : i32, i32
  }
}

</mosaic_0001>

<bundles_post_ra>
// kernel: tpu_custom_call.1
= control target key start
LH: loop header
LB: loop body
LE: loop exit
PB: predicated region body
PF: predicated region fallthrough
CT: control target
= control target key end

     0   :  { %6 = vsyncpa [#allocation3], 0  ;;  %s106_s0 = inlined_call_operand.hbm [shape: f32[2,1024], index: 0, kind: input, shape index: {}]   ;;  %s107_s1 = inlined_call_operand.hbm [shape: f32[2,1024], index: 1, kind: output, shape index: {}]  }
   0x1   :  { %7 = vsyncpa [#allocation4], 0  ;;  %s88_s6 = smov [#allocation2]  }
   0x2   :  { %s14_s7 = sshll.u32 %s88_s6, 4  ;;  %s15_s7 = int_to_ptr.vmem [resolvable:$true] %s14_s7 }
   0x3   :  { %s52_s8 = scalar_lea.vmem %s15_s7, 256  ;;  %p57_p1 = scmp.lt.s32.totalorder %s15_s7, %s15_s7 }
   0x4   :  { %p53_p0 = scmp.ne.s32.totalorder %s15_s7, %s52_s8  ;;  %p58_p2 = scmp.lt.s32.totalorder %s52_s8, %s52_s8 }
   0x6   :  { %p59_p3 = por %p58_p2, %p57_p1 }
   0x8   :  { %p60_p4 = pnand %p59_p3, %p53_p0 }
   0xa   :  { %63 = shalt.err (!%p60_p4)
}
   0xb   :  { %17 = dma.hbm_to_vmem [thread:$0]  %s106_s0, 256, %s15_s7, [#allocation3]  }
   0xc   :  { %84 = dma.done.wait [#allocation3], 256  }
   0xd   :  { %85 = vsyncadd [#allocation3], 4294967040  ;;  %s89_s11 = smov [#allocation5]   ;;  %v21_v0 = vld [vmem:[#allocation2] sm:$0xff]  ;;  %v22_v1 = vld [vmem:[#allocation2 + $0x8] sm:$0xff] }
   0xe   :  { %s33_s12 = sshll.u32 %s89_s11, 4  ;;  %v23_v2 = vmax.f32 %v21_v0, 0.0  ;;  %v24_v3 = vmax.f32 %v22_v1, 0.0  ;;  %s34_s12 = int_to_ptr.vmem [resolvable:$true] %s33_s12 }
   0xf   :  { %s64_s13 = scalar_lea.vmem %s34_s12, 256  ;;  %p69_p6 = scmp.lt.s32.totalorder %s34_s12, %s34_s12 }
  0x10   :  { %25 = vst [vmem:[#allocation5] sm:$0xff] %v23_v2  ;;  %26 = vst [vmem:[#allocation5 + $0x8] sm:$0xff] %v24_v3  ;;  %p65_p5 = scmp.ne.s32.totalorder %s34_s12, %s64_s13  ;;  %p70_p7 = scmp.lt.s32.totalorder %s64_s13, %s64_s13 }
  0x12   :  { %p71_p8 = por %p70_p7, %p69_p6 }
  0x14   :  { %p72_p9 = pnand %p71_p8, %p65_p5 }
  0x16   :  { %75 = shalt.err (!%p72_p9)
}
  0x17   :  { %36 = dma.vmem_to_hbm [thread:$0]  %s34_s12, 256, %s107_s1, [#allocation4]  }
  0x18   :  { %86 = dma.done.wait [#allocation4], 256  }
  0x19   :  { %87 = vsyncadd [#allocation4], 4294967040 }
  0x1a   :  { %40 = vsyncpa [#allocation3], 1 }
  0x1b   :  { %41 = vsyncpa [#allocation4], 1 }

</bundles_post_ra>
